<compile_context>
chip_gen: v6e
topology: v6e:2x2x1
jax: 0.10.0
libtpu: 0.0.40
codegen_flags: <defaults>
</compile_context>

<pallas_src>
import jax
import jax.numpy as jnp
from jax.experimental import pallas as pl
from jax.experimental.pallas import tpu as pltpu

INPUT_SIZE = 784
HIDDEN_SIZE = 100
NUM_CLASSES = 10

HIDDEN_PAD = 128   # 100 -> 128 lanes
OUT_PAD = 128      # 10  -> 128 lanes (unmasked stores)
TILE_B = 512       # batch tile; safe for v5e/v6e/v7x default scoped VMEM


def _round_up(x, m):
    return ((x + m - 1) // m) * m


def mlp_kernel(x_ref, w1_ref, b1_ref, w2_ref, b2_ref, o_ref):
    # layer1: [TB, 784]bf16 @ [784, 128]bf16 -> f32 accumulate, + f32 bias, ReLU
    h = jnp.dot(x_ref[...], w1_ref[...], preferred_element_type=jnp.float32)
    h = jnp.maximum(h + b1_ref[...], 0.0)
    # layer2: [TB, 128]bf16 @ [128, 128]bf16 -> f32 accumulate, + f32 bias
    out = jnp.dot(h.astype(jnp.bfloat16), w2_ref[...],
                  preferred_element_type=jnp.float32)
    o_ref[...] = out + b2_ref[...]


def neural_net_forward(x, w1, b1, w2, b2, *, tile_b=TILE_B):
    """Forward pass of NeuralNet.

    x : [B, 784] f32
    w1: [784, 100] f32 (stored pre-transposed, i.e. PyTorch layer1.weight.T)
    b1: [1, 100]  f32
    w2: [100, 10] f32 (PyTorch layer2.weight.T)
    b2: [1, 10]   f32
    returns [B, 10] f32
    """
    B = x.shape[0]

    # --- lane-dense padding of weights/biases (zeros do not change the math) ---
    w1p = jnp.zeros((INPUT_SIZE, HIDDEN_PAD), jnp.bfloat16)
    w1p = w1p.at[:, :HIDDEN_SIZE].set(w1.astype(jnp.bfloat16))
    b1p = jnp.zeros((1, HIDDEN_PAD), jnp.float32).at[:, :HIDDEN_SIZE].set(b1)
    w2p = jnp.zeros((HIDDEN_PAD, OUT_PAD), jnp.bfloat16)
    w2p = w2p.at[:HIDDEN_SIZE, :NUM_CLASSES].set(w2.astype(jnp.bfloat16))
    b2p = jnp.zeros((1, OUT_PAD), jnp.float32).at[:, :NUM_CLASSES].set(b2)

    # --- batch tiling: pad B up to a multiple of the tile size ---
    tile_b = min(tile_b, _round_up(B, 8))
    b_padded = _round_up(B, tile_b)
    xp = x.astype(jnp.bfloat16)
    if b_padded != B:
        xp = jnp.pad(xp, ((0, b_padded - B), (0, 0)))

    grid = (b_padded // tile_b,)

    cost = pl.CostEstimate(
        flops=2 * b_padded * (INPUT_SIZE * HIDDEN_PAD + HIDDEN_PAD * OUT_PAD),
        transcendentals=0,
        bytes_accessed=(b_padded * INPUT_SIZE * 2          # x (bf16)
                        + INPUT_SIZE * HIDDEN_PAD * 2      # w1 (bf16)
                        + HIDDEN_PAD * OUT_PAD * 2         # w2 (bf16)
                        + (HIDDEN_PAD + OUT_PAD) * 4       # biases
                        + b_padded * OUT_PAD * 4),         # output (f32)
    )

    out = pl.pallas_call(
        mlp_kernel,
        out_shape=jax.ShapeDtypeStruct((b_padded, OUT_PAD), jnp.float32),
        grid_spec=pltpu.PrefetchScalarGridSpec(
            num_scalar_prefetch=0,
            grid=grid,
            in_specs=[
                # x: streamed per batch tile
                pl.BlockSpec((tile_b, INPUT_SIZE), lambda i: (i, 0)),
                # weights/biases: constant block index -> resident in VMEM
                pl.BlockSpec((INPUT_SIZE, HIDDEN_PAD), lambda i: (0, 0)),
                pl.BlockSpec((1, HIDDEN_PAD), lambda i: (0, 0)),
                pl.BlockSpec((HIDDEN_PAD, OUT_PAD), lambda i: (0, 0)),
                pl.BlockSpec((1, OUT_PAD), lambda i: (0, 0)),
            ],
            out_specs=pl.BlockSpec((tile_b, OUT_PAD), lambda i: (i, 0)),
        ),
        compiler_params=pltpu.CompilerParams(
            dimension_semantics=("parallel",),
        ),
        cost_estimate=cost,
    )(xp, w1p, b1p, w2p, b2p)

    return out[:B, :NUM_CLASSES]


def init_params(key):
    """Deterministic init matching PyTorch nn.Linear default: U(-1/sqrt(fan_in), 1/sqrt(fan_in))."""
    k1, k2, k3, k4 = jax.random.split(key, 4)
    bound1 = 1.0 / jnp.sqrt(float(INPUT_SIZE))
    bound2 = 1.0 / jnp.sqrt(float(HIDDEN_SIZE))
    # stored pre-transposed: [in, out]
    w1 = jax.random.uniform(k1, (INPUT_SIZE, HIDDEN_SIZE), jnp.float32, -bound1, bound1)
    b1 = jax.random.uniform(k2, (1, HIDDEN_SIZE), jnp.float32, -bound1, bound1)
    w2 = jax.random.uniform(k3, (HIDDEN_SIZE, NUM_CLASSES), jnp.float32, -bound2, bound2)
    b2 = jax.random.uniform(k4, (1, NUM_CLASSES), jnp.float32, -bound2, bound2)
    return w1, b1, w2, b2


if __name__ == "__main__":
    key = jax.random.PRNGKey(0)
    kx, kp = jax.random.split(key)
    batch = 8
    x = jax.random.normal(kx, (batch, INPUT_SIZE), jnp.float32)
    w1, b1, w2, b2 = init_params(kp)

    out = neural_net_forward(x, w1, b1, w2, b2)
    jax.block_until_ready(out)

    # reference check in plain JAX (f32); kernel uses bf16 matmul inputs with
    # f32 accumulation, so tolerance is loosened accordingly.
    ref = jnp.maximum(x @ w1 + b1, 0.0) @ w2 + b2
    assert out.shape == (batch, NUM_CLASSES)
    assert jnp.allclose(out, ref, atol=2e-2, rtol=2e-2), (
        float(jnp.max(jnp.abs(out - ref))))
    print("KERNEL_OK")
</pallas_src>

<mosaic_0001>
module attributes {stable_mosaic.version = 11 : i64} {
  func.func @mlp_kernel(%arg0: i32, %arg1: memref<8x784xbf16, #tpu.memory_space<vmem>>, %arg2: memref<784x128xbf16, #tpu.memory_space<vmem>>, %arg3: memref<1x128xf32, #tpu.memory_space<vmem>>, %arg4: memref<128x128xbf16, #tpu.memory_space<vmem>>, %arg5: memref<1x128xf32, #tpu.memory_space<vmem>>, %arg6: memref<8x128xf32, #tpu.memory_space<vmem>>) attributes {dimension_semantics = [#tpu.dimension_semantics<parallel>], iteration_bounds = array<i64: 1>, scalar_prefetch = 0 : i64, scratch_operands = 0 : i64, tpu.core_type = #tpu.core_type<tc>, window_params = [{transform_indices = @transform_0, window_bounds = array<i64: 8, 784>}, {pipeline_mode = #tpu.pipeline_mode<synchronous>, transform_indices = @transform_1, window_bounds = array<i64: 784, 128>}, {pipeline_mode = #tpu.pipeline_mode<synchronous>, transform_indices = @transform_2, window_bounds = array<i64: 1, 128>}, {pipeline_mode = #tpu.pipeline_mode<synchronous>, transform_indices = @transform_3, window_bounds = array<i64: 128, 128>}, {pipeline_mode = #tpu.pipeline_mode<synchronous>, transform_indices = @transform_4, window_bounds = array<i64: 1, 128>}, {transform_indices = @transform_5, window_bounds = array<i64: 8, 128>}]} {
    %c0 = arith.constant 0 : index
    %c0_0 = arith.constant 0 : index
    %0 = vector.load %arg1[%c0, %c0_0] : memref<8x784xbf16, #tpu.memory_space<vmem>>, vector<8x784xbf16>
    %c0_1 = arith.constant 0 : index
    %c0_2 = arith.constant 0 : index
    %1 = vector.load %arg2[%c0_1, %c0_2] : memref<784x128xbf16, #tpu.memory_space<vmem>>, vector<784x128xbf16>
    %cst = arith.constant dense<0.000000e+00> : vector<8x128xf32>
    %2 = tpu.matmul %0, %1, %cst {dimension_numbers = #tpu.dot_dimension_numbers<[1], [0], [0], [1], [0, 0, 1, 1], [], []>} : vector<8x784xbf16>, vector<784x128xbf16>, vector<8x128xf32> -> vector<8x128xf32>
    %c0_3 = arith.constant 0 : index
    %c0_4 = arith.constant 0 : index
    %3 = vector.load %arg3[%c0_3, %c0_4] : memref<1x128xf32, #tpu.memory_space<vmem>>, vector<1x128xf32>
    %4 = vector.broadcast %3 : vector<1x128xf32> to vector<8x128xf32>
    %5 = arith.addf %2, %4 : vector<8x128xf32>
    %cst_5 = arith.constant 0.000000e+00 : f32
    %6 = vector.broadcast %cst_5 : f32 to vector<8x128xf32>
    %7 = arith.maximumf %5, %6 : vector<8x128xf32>
    %8 = arith.truncf %7 : vector<8x128xf32> to vector<8x128xbf16>
    %c0_6 = arith.constant 0 : index
    %c0_7 = arith.constant 0 : index
    %9 = vector.load %arg4[%c0_6, %c0_7] : memref<128x128xbf16, #tpu.memory_space<vmem>>, vector<128x128xbf16>
    %cst_8 = arith.constant dense<0.000000e+00> : vector<8x128xf32>
    %10 = tpu.matmul %8, %9, %cst_8 {dimension_numbers = #tpu.dot_dimension_numbers<[1], [0], [0], [1], [0, 0, 1, 1], [], []>} : vector<8x128xbf16>, vector<128x128xbf16>, vector<8x128xf32> -> vector<8x128xf32>
    %c0_9 = arith.constant 0 : index
    %c0_10 = arith.constant 0 : index
    %11 = vector.load %arg5[%c0_9, %c0_10] : memref<1x128xf32, #tpu.memory_space<vmem>>, vector<1x128xf32>
    %12 = vector.broadcast %11 : vector<1x128xf32> to vector<8x128xf32>
    %13 = arith.addf %10, %12 : vector<8x128xf32>
    %c0_11 = arith.constant 0 : index
    %c0_12 = arith.constant 0 : index
    %14 = vector.load %arg6[%c0_11, %c0_12] : memref<8x128xf32, #tpu.memory_space<vmem>>, vector<8x128xf32>
    tpu.vector_store %arg6[%c0_11, %c0_12], %13 {strides = array<i32>} : memref<8x128xf32, #tpu.memory_space<vmem>>, vector<8x128xf32>,
    return
  }
  func.func @transform_0(%arg0: i32) -> (i32, i32) {
    %c0_i32 = arith.constant 0 : i32
    %c0_i32_0 = arith.constant 0 : i32
    return %arg0, %c0_i32 : i32, i32
  }
  func.func @transform_1(%arg0: i32) -> (i32, i32) {
    %c0_i32 = arith.constant 0 : i32
    %c0_i32_0 = arith.constant 0 : i32
    %c0_i32_1 = arith.constant 0 : i32
    return %c0_i32, %c0_i32_0 : i32, i32
  }
  func.func @transform_2(%arg0: i32) -> (i32, i32) {
    %c0_i32 = arith.constant 0 : i32
    %c0_i32_0 = arith.constant 0 : i32
    %c0_i32_1 = arith.constant 0 : i32
    return %c0_i32, %c0_i32_0 : i32, i32
  }
  func.func @transform_3(%arg0: i32) -> (i32, i32) {
    %c0_i32 = arith.constant 0 : i32
    %c0_i32_0 = arith.constant 0 : i32
    %c0_i32_1 = arith.constant 0 : i32
    return %c0_i32, %c0_i32_0 : i32, i32
  }
  func.func @transform_4(%arg0: i32) -> (i32, i32) {
    %c0_i32 = arith.constant 0 : i32
    %c0_i32_0 = arith.constant 0 : i32
    %c0_i32_1 = arith.constant 0 : i32
    return %c0_i32, %c0_i32_0 : i32, i32
  }
  func.func @transform_5(%arg0: i32) -> (i32, i32) {
    %c0_i32 = arith.constant 0 : i32
    %c0_i32_0 = arith.constant 0 : i32
    return %arg0, %c0_i32 : i32, i32
  }
}

</mosaic_0001>

<bundles_post_ra>
// kernel: tpu_custom_call.1
= control target key start
LH: loop header
LB: loop body
LE: loop exit
PB: predicated region body
PF: predicated region fallthrough
CT: control target
= control target key end

     0   :  { %10 = vsyncpa [#allocation3], 0  ;;  %s1168_s0 = inlined_call_operand.hbm [shape: bf16[8,784], index: 0, kind: input, shape index: {}]   ;;  %s1169_s1 = inlined_call_operand.hbm [shape: bf16[784,128], index: 1, kind: input, shape index: {}]   ;;  %s1170_s2 = inlined_call_operand.vmem [shape: f32[1,128], index: 2, kind: input, shape index: {}]   ;;  %s1171_s3 = inlined_call_operand.hbm [shape: bf16[128,128], index: 3, kind: input, shape index: {}]   ;;  %s1172_s4 = inlined_call_operand.vmem [shape: f32[1,128], index: 4, kind: input, shape index: {}]   ;;  %s1173_s5 = inlined_call_operand.hbm [shape: f32[8,128], index: 5, kind: output, shape index: {}]  }
   0x1   :  { %11 = vsyncpa [#allocation6], 0 }
   0x2   :  { %12 = vsyncpa [#allocation4], 0  ;;  %s1110_s18 = smov [#allocation5]  }
   0x3   :  { %s28_s19 = sshll.u32 %s1110_s18, 4  ;;  %s29_s19 = int_to_ptr.vmem [resolvable:$true] %s28_s19 }
   0x4   :  { %s1032_s20 = scalar_lea.vmem %s29_s19, 6272  ;;  %p1037_p1 = scmp.lt.s32.totalorder %s29_s19, %s29_s19 }
   0x5   :  { %p1033_p0 = scmp.ne.s32.totalorder %s29_s19, %s1032_s20  ;;  %p1038_p2 = scmp.lt.s32.totalorder %s1032_s20, %s1032_s20 }
   0x7   :  { %p1039_p3 = por %p1038_p2, %p1037_p1 }
   0x9   :  { %p1040_p4 = pnand %p1039_p3, %p1033_p0 }
   0xb   :  { %1043 = shalt.err (!%p1040_p4)
}
   0xc   :  { %s1111_s21 = smov 64   ;;  %s1112_s22 = smov 4  }
   0xd   :  { %34 = dma.hbm_to_vmem [thread:$0]  %s1169_s1, 6272, %s29_s19, [#allocation6], %s1111_s21, %s1111_s21, %s1112_s22  }
   0xe   :  { %s1113_s25 = smov [#allocation2]   ;;  %s1114_s27 = smov [#allocation7]  }
   0xf   :  { %s19_s26 = sshll.u32 %s1113_s25, 4  ;;  %s42_s28 = sshll.u32 %s1114_s27, 4  ;;  %s20_s26 = int_to_ptr.vmem [resolvable:$true] %s19_s26  ;;  %s43_s28 = int_to_ptr.vmem [resolvable:$true] %s42_s28 }
  0x10   :  { %s1052_s29 = scalar_lea.vmem %s20_s26, 448  ;;  %p1057_p6 = scmp.lt.s32.totalorder %s20_s26, %s20_s26 }
  0x11   :  { %p1053_p5 = scmp.ne.s32.totalorder %s20_s26, %s1052_s29  ;;  %p1058_p7 = scmp.lt.s32.totalorder %s1052_s29, %s1052_s29 }
  0x13   :  { %p1059_p8 = por %p1058_p7, %p1057_p6 }
  0x15   :  { %p1060_p9 = pnand %p1059_p8, %p1053_p5 }
  0x17   :  { %1063 = shalt.err (!%p1060_p9)
}
  0x18   :  { %22 = dma.hbm_to_vmem [thread:$0]  %s1168_s0, 448, %s20_s26, [#allocation3]  }
  0x19   :  { %s1072_s7 = scalar_lea.vmem %s43_s28, 1024  ;;  %p1077_p11 = scmp.lt.s32.totalorder %s43_s28, %s43_s28 }
  0x1a   :  { %p1073_p10 = scmp.ne.s32.totalorder %s43_s28, %s1072_s7  ;;  %p1078_p12 = scmp.lt.s32.totalorder %s1072_s7, %s1072_s7 }
  0x1c   :  { %p1079_p13 = por %p1078_p12, %p1077_p11 }
  0x1e   :  { %p1080_p0 = pnand %p1079_p13, %p1073_p10 }
  0x20   :  { %1083 = shalt.err (!%p1080_p0)
}
  0x21   :  { %48 = dma.hbm_to_vmem [thread:$0]  %s1171_s3, 1024, %s43_s28, [#allocation6], %s1111_s21, %s1111_s21, %s1112_s22  }
  0x22   :  { %1104 = dma.done.wait [#allocation3], 448  }
  0x23   :  { %1105 = vsyncadd [#allocation3], 4294966848 }
  0x24   :  { %1106 = dma.done.wait [#allocation6], 7296  }
  0x25   :  { %1107 = vsyncadd [#allocation6], 4294960000  ;;  %v960_v0 = vld [vmem:[#allocation5 + $0x78] sm:$0xff]   ;;  %v964_v4 = vld [vmem:[#allocation5 + $0x70] sm:$0xff]   ;;  %v1115_v43 = vmov 0.0   ;;  %vm1116_vm0 = vmmov 0  }
  0x26   :  { %v961_v1 = vld [vmem:[#allocation5 + $0x38] sm:$0xff]   ;;  %849 = vmatprep.subr.bf16.mxu0 %v960_v0  ;;  %v965_v5 = vld [vmem:[#allocation5 + $0x30] sm:$0xff]   ;;  %v968_v8 = vld [vmem:[#allocation5 + $0x68] sm:$0xff]   ;;  %vm488_vm1 = vcmask 130048   ;;  %s1117_s11 = smov [#allocation8]  }
  0x27   :  { %v962_v2 = vld [vmem:[#allocation5 + $0xf8] sm:$0xff]   ;;  %850 = vmatpush3.bf16.msra.mxu0 %v961_v1  ;;  %v966_v6 = vld [vmem:[#allocation5 + $0xf0] sm:$0xff]   ;;  %v969_v9 = vld [vmem:[#allocation5 + $0x28] sm:$0xff]   ;;  %s772_s12 = sshll.u32 %s1117_s11, 4  ;;  %s773_s12 = int_to_ptr.vmem [resolvable:$true] %s772_s12 }
  0x28   :  { %v963_v3 = vld [vmem:[#allocation5 + $0xb8] sm:$0xff]   ;;  %871 = vmatprep.subr.bf16.mxu1 %v962_v2  ;;  %851 = vmatprep.subr.bf16.mxu0 %v964_v4  ;;  %v967_v7 = vld [vmem:[#allocation5 + $0xb0] sm:$0xff]   ;;  %v970_v10 = vld [vmem:[#allocation5 + $0xe8] sm:$0xff]   ;;  %p1089_p2 = scmp.lt.s32.totalorder %s773_s12, %s773_s12 }
  0x29   :  { %872 = vmatpush3.bf16.msra.mxu1 %v963_v3  ;;  %v971_v11 = vld [vmem:[#allocation5 + $0xa8] sm:$0xff]   ;;  %v972_v12 = vld [vmem:[#allocation5 + $0x60] sm:$0xff]   ;;  %v976_v16 = vld [vmem:[#allocation5 + $0x58] sm:$0xff]  }
  0x2a   :  { %873 = vmatprep.subr.bf16.mxu1 %v966_v6  ;;  %v973_v13 = vld [vmem:[#allocation5 + $0x20] sm:$0xff]   ;;  %v977_v17 = vld [vmem:[#allocation5 + $0x18] sm:$0xff]   ;;  %v980_v20 = vld [vmem:[#allocation5 + $0x50] sm:$0xff]  }
  0x2b   :  { %852 = vmatpush3.bf16.msra.mxu0 %v965_v5  ;;  %v974_v14 = vld [vmem:[#allocation5 + $0xe0] sm:$0xff]   ;;  %v978_v18 = vld [vmem:[#allocation5 + $0xd8] sm:$0xff]   ;;  %v981_v21 = vld [vmem:[#allocation5 + $0x10] sm:$0xff]  }
  0x2c   :  { %853 = vmatprep.subr.bf16.mxu0 %v968_v8  ;;  %v975_v15 = vld [vmem:[#allocation5 + $0xa0] sm:$0xff]   ;;  %v979_v19 = vld [vmem:[#allocation5 + $0x98] sm:$0xff]   ;;  %v982_v22 = vld [vmem:[#allocation5 + $0xd0] sm:$0xff]  }
  0x2d   :  { %874 = vmatpush3.bf16.msra.mxu1 %v967_v7  ;;  %v983_v23 = vld [vmem:[#allocation5 + $0x90] sm:$0xff]   ;;  %v984_v24 = vld [vmem:[#allocation5 + $0x48] sm:$0xff]   ;;  %v988_v28 = vld [vmem:[#allocation5 + $0x40] sm:$0xff]  }
  0x2e   :  { %875 = vmatprep.subr.bf16.mxu1 %v970_v10  ;;  %v985_v25 = vld [vmem:[#allocation5 + $0x8] sm:$0xff]   ;;  %v989_v29 = vld [vmem:[#allocation5] sm:$0xff]   ;;  %v994_v35 = vld [vmem:[#allocation5 + $0x178] sm:$0xff]  }
  0x2f   :  { %854 = vmatpush3.bf16.msra.mxu0 %v969_v9  ;;  %v986_v26 = vld [vmem:[#allocation5 + $0xc8] sm:$0xff]   ;;  %v990_v30 = vld [vmem:[#allocation5 + $0xc0] sm:$0xff]   ;;  %v997_v39 = vld [vmem:[#allocation5 + $0x138] sm:$0xff]  }
  0x30   :  { %855 = vmatprep.subr.bf16.mxu0 %v972_v12  ;;  %v987_v27 = vld [vmem:[#allocation5 + $0x88] sm:$0xff]   ;;  %v993_v34 = vld [vmem:[#allocation5 + $0x80] sm:$0xff]   ;;  %v998_v40 = vld [vmem:[#allocation5 + $0x170] sm:$0xff]  }
  0x31   :  { %876 = vmatpush3.bf16.msra.mxu1 %v971_v11  ;;  %v61_v31 = vld [vmem:[#allocation2] sm:$0xff]  ;;  %v62_v36 = vld [vmem:[#allocation2 + $0x8] sm:$0xff]  ;;  %v1004_v47 = vld [vmem:[#allocation5 + $0x158] sm:$0xff]  }
  0x32   :  { %877 = vmatprep.subr.bf16.mxu1 %v974_v14  ;;  %v783_v32 = vcombine.low %v61_v31, %v61_v31  ;;  %v784_v33 = vcombine.high %v61_v31, %v61_v31  ;;  %v785_v37 = vcombine.low %v62_v36, %v62_v36  ;;  %v786_v38 = vcombine.high %v62_v36, %v62_v36  ;;  %v999_v41 = vld [vmem:[#allocation5 + $0x130] sm:$0xff]   ;;  %v1000_v42 = vld [vmem:[#allocation5 + $0x168] sm:$0xff]   ;;  %v1002_v45 = vld [vmem:[#allocation5 + $0x160] sm:$0xff]  }
  0x33   :  { %856 = vmatpush3.bf16.msra.mxu0 %v973_v13  ;;  %v1001_v44 = vld [vmem:[#allocation5 + $0x128] sm:$0xff]   ;;  %v1003_v46 = vld [vmem:[#allocation5 + $0x120] sm:$0xff]   ;;  %v1005_v48 = vld [vmem:[#allocation5 + $0x118] sm:$0xff]  }
  0x34   :  { %857 = vmatprep.subr.bf16.mxu0 %v976_v16  ;;  %524 = vmatprep.mubr.bf16.mxu0 %v784_v33  ;;  %v1006_v49 = vld [vmem:[#allocation5 + $0x150] sm:$0xff]   ;;  %v1012_v50 = vld [vmem:[#allocation5 + $0x180] sm:$0xff]   ;;  %v1015_v54 = vld [vmem:[#allocation2 + $0x18] ss:$0 sps:$4 sm:$0xff]  }
  0x35   :  { %878 = vmatpush3.bf16.msra.mxu1 %v975_v15  ;;  %564 = vmatprep.mubr.bf16.mxu1 %v786_v38  ;;  %v63_v51 = vld [vmem:[#allocation2 + $0x10] sm:$0xff]  ;;  %v1008_v55 = vld [vmem:[#allocation5 + $0x148] sm:$0xff]   ;;  %v1010_v57 = vld [vmem:[#allocation5 + $0x140] sm:$0xff]  }
  0x36   :  { %879 = vmatprep.subr.bf16.mxu1 %v978_v18  ;;  %v1007_v52 = vld [vmem:[#allocation5 + $0x110] sm:$0xff]   ;;  %v788_v53 = vcombine.high %v63_v51, %v63_v51  ;;  %v1009_v56 = vld [vmem:[#allocation5 + $0x108] sm:$0xff]   ;;  %v1011_v58 = vld [vmem:[#allocation5 + $0x100] sm:$0xff]   ;;  %v787_v59 = vcombine.low %v63_v51, %v63_v51 }
  0x37   :  { %858 = vmatpush3.bf16.msra.mxu0 %v977_v17  ;;  %v1016_v60 = vld [vmem:[#allocation7 + $0x38] sm:$0xff]   ;;  %v1017_v61 = vld [vmem:[#allocation7 + $0x30] sm:$0xff]   ;;  %v1018_v62 = vld [vmem:[#allocation7 + $0x28] sm:$0xff]  }
  0x38   :  { %859 = vmatprep.subr.bf16.mxu0 %v980_v20  ;;  %v1019_v63 = vld [vmem:[#allocation7 + $0x20] sm:$0xff]   ;;  %v1020_v0 = vld [vmem:[#allocation7 + $0x18] sm:$0xff]   ;;  %v1021_v1 = vld [vmem:[#allocation7 + $0x10] sm:$0xff]  }
  0x39   :  { %880 = vmatpush3.bf16.msra.mxu1 %v979_v19  ;;  %v1022_v2 = vld [vmem:[#allocation7 + $0x8] sm:$0xff]   ;;  %v1023_v3 = vld [vmem:[#allocation7] sm:$0xff]   ;;  %v782_v17 = vld [vmem:[%s1170_s2] ss:$0 sm:$0xff]  ;;  %s1084_s2 = scalar_lea.vmem %s773_s12, 128 }
  0x3a   :  { %881 = vmatprep.subr.bf16.mxu1 %v982_v22  ;;  %p1085_p1 = scmp.ne.s32.totalorder %s773_s12, %s1084_s2  ;;  %p1090_p3 = scmp.lt.s32.totalorder %s1084_s2, %s1084_s2 }
  0x3b   :  { %860 = vmatpush3.bf16.msra.mxu0 %v981_v21 }
  0x3c   :  { %861 = vmatprep.subr.bf16.mxu0 %v984_v24  ;;  %p1091_p4 = por %p1090_p3, %p1089_p2 }
  0x3d   :  { %882 = vmatpush3.bf16.msra.mxu1 %v983_v23 }
  0x3e   :  { %883 = vmatprep.subr.bf16.mxu1 %v986_v26  ;;  %p1092_p5 = pnand %p1091_p4, %p1085_p1 }
  0x3f   :  { %862 = vmatpush3.bf16.msra.mxu0 %v985_v25 }
  0x40   :  { %863 = vmatprep.subr.bf16.mxu0 %v988_v28 }
  0x41   :  { %884 = vmatpush3.bf16.msra.mxu1 %v987_v27 }
  0x42   :  { %885 = vmatprep.subr.bf16.mxu1 %v990_v30  ;;  %v840_v30 = vld [vmem:[%s1172_s4] ss:$0 sm:$0xff] }
  0x43   :  { %864 = vmatpush3.bf16.msra.mxu0 %v989_v29 }
  0x44   :  { %893 = vmatprep.subr.bf16.mxu0 %v994_v35 }
  0x45   :  { %886 = vmatpush3.bf16.msra.mxu1 %v993_v34 }
  0x46   :  { %525 = vmatmul.mubr.bf16.vlgmr.msra.gmra.mxu0 %v783_v32  ;;  %926 = vmatprep.subr.bf16.mxu1 %v1115_v43 }
  0x47   :  { %894 = vmatpush3.bf16.msra.mxu0 %v997_v39  ;;  %604 = vmatprep.mubr.bf16.mxu0 %v788_v53 }
  0x48   :  { %565 = vmatmul.mubr.bf16.vlgmr.msra.gmra.mxu1 %v785_v37  ;;  %895 = vmatprep.subr.bf16.mxu0 %v998_v40 }
  0x49   :  { %928 = vmatprep.mubr.msk.bf16.mxu1 %vm1116_vm0, %v1115_v43  ;;  %927 = vmatpush3.bf16.msra.mxu1 %v1012_v50 }
  0x4a   :  { %932 = vmatprep.subr.bf16.mxu1 %v1115_v43 }
  0x4b   :  { %896 = vmatpush3.bf16.msra.mxu0 %v999_v41 }
  0x4c   :  { %897 = vmatprep.subr.bf16.mxu0 %v1000_v42 }
  0x4f   :  { %898 = vmatpush3.bf16.msra.mxu0 %v1001_v44 }
  0x50   :  { %899 = vmatprep.subr.bf16.mxu0 %v1002_v45  ;;  %929 = vmatmul.mubr.msk.bf16.vlgmr.msra.gmra.mxu1 %vm488_vm1, %v1015_v54 }
  0x51   :  { %948 = vmatprep.mubr.msk.bf16.mxu1 %vm1116_vm0, %v1115_v43  ;;  %933 = vmatpush3.bf16.msra.mxu1 %v1016_v60 }
  0x52   :  { %934 = vmatprep.subr.bf16.mxu1 %v1115_v43 }
  0x53   :  { %900 = vmatpush3.bf16.msra.mxu0 %v1003_v46 }
  0x54   :  { %901 = vmatprep.subr.bf16.mxu0 %v1004_v47 }
  0x55   :  { %935 = vmatpush3.bf16.msra.mxu1 %v1017_v61 }
  0x56   :  { %936 = vmatprep.subr.bf16.mxu1 %v1115_v43 }
  0x57   :  { %902 = vmatpush3.bf16.msra.mxu0 %v1005_v48 }
  0x58   :  { %903 = vmatprep.subr.bf16.mxu0 %v1006_v49 }
  0x59   :  { %937 = vmatpush3.bf16.msra.mxu1 %v1018_v62 }
  0x5a   :  { %938 = vmatprep.subr.bf16.mxu1 %v1115_v43 }
  0x5b   :  { %904 = vmatpush3.bf16.msra.mxu0 %v1007_v52 }
  0x5c   :  { %905 = vmatprep.subr.bf16.mxu0 %v1008_v55 }
  0x5d   :  { %939 = vmatpush3.bf16.msra.mxu1 %v1019_v63 }
  0x5e   :  { %940 = vmatprep.subr.bf16.mxu1 %v1115_v43 }
  0x5f   :  { %906 = vmatpush3.bf16.msra.mxu0 %v1009_v56 }
  0x60   :  { %907 = vmatprep.subr.bf16.mxu0 %v1010_v57 }
  0x61   :  { %941 = vmatpush3.bf16.msra.mxu1 %v1020_v0 }
  0x62   :  { %942 = vmatprep.subr.bf16.mxu1 %v1115_v43 }
  0x63   :  { %908 = vmatpush3.bf16.msra.mxu0 %v1011_v58 }
  0x65   :  { %943 = vmatpush3.bf16.msra.mxu1 %v1021_v1 }
  0x66   :  { %605 = vmatmul.mubr.bf16.vlgmr.msra.gmra.mxu0 %v787_v59  ;;  %944 = vmatprep.subr.bf16.mxu1 %v1115_v43 }
  0x69   :  { %945 = vmatpush3.bf16.msra.mxu1 %v1022_v2 }
  0x6a   :  { %946 = vmatprep.subr.bf16.mxu1 %v1115_v43 }
  0x6d   :  { %947 = vmatpush3.bf16.msra.mxu1 %v1023_v3 }
 0x106   :  { %v865_v4 = vpop.f32.mrf.mxu0 }
 0x108   :  { %v866_v5 = vpop.f32.mrf.mxu0  ;;  %v887_v6 = vpop.f32.mrf.mxu1 }
 0x109   :  { %v867_v16 = vadd.f32 %v866_v5, %v865_v4 }
 0x10a   :  { %v868_v7 = vpop.f32.mrf.mxu0  ;;  %v888_v8 = vpop.f32.mrf.mxu1 }
 0x10b   :  { %v527_v18 = vadd.f32 %v867_v16, %v782_v17  ;;  %v889_v19 = vadd.f32 %v888_v8, %v887_v6 }
 0x10c   :  { %v869_v9 = vpop.f32.mrf.mxu0  ;;  %v890_v10 = vpop.f32.mrf.mxu1 }
 0x10d   :  { %v567_v22 = vadd.f32 %v889_v19, %v527_v18 }
 0x10e   :  { %v891_v11 = vpop.f32.mrf.mxu1 }
 0x110   :  { %v646_v12 = vpop.f32.mrf.mxu1 }
 0x112   :  { %v930_v13 = vpop.f32.mrf.mxu1 }
 0x114   :  { %v649_v14 = vpop.f32.mrf.mxu1 }
 0x116   :  { %v931_v15 = vpop.f32.mrf.mxu1 }
 0x126   :  { %v909_v20 = vpop.f32.mrf.mxu0 }
 0x128   :  { %v910_v21 = vpop.f32.mrf.mxu0 }
 0x129   :  { %v911_v23 = vadd.f32 %v910_v21, %v909_v20 }
 0x12a   :  { %v912_v24 = vpop.f32.mrf.mxu0 }
 0x12b   :  { %v607_v25 = vadd.f32 %v911_v23, %v567_v22 }
 0x12c   :  { %v913_v26 = vpop.f32.mrf.mxu0 }
 0x12d   :  { %v647_v27 = vadd.f32 %v646_v12, %v607_v25 }
 0x12f   :  { %v652_v28 = vmax.f32 %v647_v27, 0.0 }
 0x131   :  { %v653_v29 = vpack.c.bf16 %v652_v28, %v652_v28 }
 0x133   :  { %949 = vmatmul.mubr.bf16.vlgmr.msra.gmra.mxu1 %v653_v29 }
 0x1f3   :  { %v759_v31 = vpop.f32.mrf.mxu1 }
 0x1f4   :  { %v760_v32 = vadd.f32 %v840_v30, %v759_v31 }
 0x1f5   :  { %v950_v33 = vpop.f32.mrf.mxu1 }
 0x1f6   :  { %765 = vst [vmem:[#allocation8] sm:$0xff] %v760_v32 }
 0x1f7   :  { %v762_v34 = vpop.f32.mrf.mxu1 }
 0x1f8   :  { %1095 = shalt.err (!%p1092_p5)
}
 0x1f9   :  { %775 = dma.vmem_to_hbm [thread:$0]  %s773_s12, 128, %s1173_s5, [#allocation4]   ;;  %v951_v35 = vpop.f32.mrf.mxu1 }
 0x1fa   :  { %1108 = dma.done.wait [#allocation4], 128  }
 0x1fb   :  { %1109 = vsyncadd [#allocation4], 4294967168 }
 0x1fc   :  { %779 = vsyncpa [#allocation3], 1 }
 0x1fd   :  { %780 = vsyncpa [#allocation6], 1 }
 0x1fe   :  { %781 = vsyncpa [#allocation4], 1 }

</bundles_post_ra>
